<compile_context>
chip_gen: v6e
topology: v6e:2x2x1
jax: 0.10.0
libtpu: 0.0.40
codegen_flags: <defaults>
</compile_context>

<pallas_src>
import functools

import jax
import jax.numpy as jnp
from jax import lax
from jax.experimental import pallas as pl
from jax.experimental.pallas import tpu as pltpu


def _pick_tile_n(n):
    """Query-tile size: full N when moderate, else a 128-aligned divisor."""
    if n <= 512:
        return n
    for t in (256, 128, 512):   # keep (tq, N) score tile modest on v7x
        if n % t == 0:
            return t
    return n  # block == full dim is always legal


def _use_bf16_exp():
    """bf16 EUP exp only on v6e / v7x (v5e has no bf16 EUP/VPU)."""
    try:
        kind = jax.devices()[0].device_kind.lower()
    except Exception:
        return False
    return ("v6" in kind) or ("v7" in kind)


def _attention_kernel(x_ref, wq_ref, wk_ref, wv_ref, wo_ref, bo_ref, o_ref,
                      *, scale, heads, dim_head, tile_n, exp_dtype):
    qi = pl.program_id(1)

    xkv = x_ref[0]                                     # (N, D) bf16, all tokens
    if tile_n == x_ref.shape[1]:                       # single query tile
        xq = xkv
    else:
        q_start = pl.multiple_of(qi * tile_n, tile_n)
        xq = x_ref[0, pl.ds(q_start, tile_n), :]       # (tq, D) bf16 query tile

    # Full-width projections: one MXU matmul each, f32 accumulation.
    q_all = jnp.dot(xq, wq_ref[...], preferred_element_type=jnp.float32)
    k_all = jnp.dot(xkv, wk_ref[...], preferred_element_type=jnp.float32)
    v_all = jnp.dot(xkv, wv_ref[...], preferred_element_type=jnp.float32)

    q_bf = (q_all * scale).astype(jnp.bfloat16)        # scale folded into q
    k_bf = k_all.astype(jnp.bfloat16)
    v_bf = v_all.astype(jnp.bfloat16)

    head_outs = []
    for h in range(heads):                             # unrolled, static slices
        s = h * dim_head
        q_h = q_bf[:, s:s + dim_head]                  # (tq, dh)
        k_h = k_bf[:, s:s + dim_head]                  # (N, dh)
        v_h = v_bf[:, s:s + dim_head]                  # (N, dh)

        # Scores: contract last axes directly (no explicit k.T).
        dots = lax.dot_general(
            q_h, k_h, dimension_numbers=(((1,), (1,)), ((), ())),
            preferred_element_type=jnp.float32)        # (tq, N)

        # Numerically-stable softmax with deferred normalization.
        m = jnp.max(dots, axis=-1, keepdims=True)
        p = jnp.exp((dots - m).astype(exp_dtype))      # unnormalized probs
        row_sum = jnp.sum(p.astype(jnp.float32), axis=-1, keepdims=True)

        pv = jnp.dot(p.astype(jnp.bfloat16), v_h,
                     preferred_element_type=jnp.float32)       # (tq, dh)
        head_outs.append(
            (pv * pl.reciprocal(row_sum, approx=True)).astype(jnp.bfloat16))

    head_out = jnp.concatenate(head_outs, axis=-1)     # (tq, inner) bf16

    # Single full-depth output projection + bias.
    out = jnp.dot(head_out, wo_ref[...],
                  preferred_element_type=jnp.float32)          # (tq, D)
    o_ref[0] = (out + bo_ref[...]).astype(o_ref.dtype)


def attention_forward(x, wqkv, wo, bo, *, heads, dim_head):
    B, N, D = x.shape
    inner = heads * dim_head
    assert wqkv.shape == (D, 3 * inner)
    assert wo.shape == (inner, D)
    assert bo.shape == (1, D)
    scale = float(dim_head) ** -0.5
    out_dtype = x.dtype

    # bf16 MXU operands everywhere; all accumulation stays f32 in-kernel.
    x_bf = x.astype(jnp.bfloat16)
    wq, wk, wv = (w.astype(jnp.bfloat16) for w in jnp.split(wqkv, 3, axis=-1))
    wo_bf = wo.astype(jnp.bfloat16)
    bo_f32 = bo.astype(jnp.float32)

    tile_n = _pick_tile_n(N)
    nq = N // tile_n
    # TODO(synk): when nq > 1 the K/V projections are recomputed per query
    # tile; for very long sequences hoist them into a pre-kernel / VMEM cache.
    # TODO(synk): for non-128-multiple N (e.g. 197) pad keys + mask the softmax
    # in production for lane-dense score tiles; correctness does not need it.

    exp_dtype = jnp.bfloat16 if _use_bf16_exp() else jnp.float32

    kernel = functools.partial(
        _attention_kernel, scale=scale, heads=heads, dim_head=dim_head,
        tile_n=tile_n, exp_dtype=exp_dtype)

    return pl.pallas_call(
        kernel,
        out_shape=jax.ShapeDtypeStruct((B, N, D), out_dtype),
        grid_spec=pltpu.PrefetchScalarGridSpec(
            num_scalar_prefetch=0,
            grid=(B, nq),
            in_specs=[
                # all tokens of this batch element (query tile sliced in-kernel)
                pl.BlockSpec((1, N, D), lambda b, qi: (b, 0, 0)),
                # VMEM-resident weights: constant block index -> DMA'd once
                pl.BlockSpec((D, inner), lambda b, qi: (0, 0)),
                pl.BlockSpec((D, inner), lambda b, qi: (0, 0)),
                pl.BlockSpec((D, inner), lambda b, qi: (0, 0)),
                pl.BlockSpec((inner, D), lambda b, qi: (0, 0)),
                pl.BlockSpec((1, D), lambda b, qi: (0, 0)),
            ],
            out_specs=pl.BlockSpec((1, tile_n, D), lambda b, qi: (b, qi, 0)),
        ),
        compiler_params=pltpu.CompilerParams(
            dimension_semantics=("parallel", "parallel"),
            vmem_limit_bytes=64 * 1024 * 1024,
        ),
    )(x_bf, wq, wk, wv, wo_bf, bo_f32)


def attention_reference(x, wqkv, wo, bo, *, heads, dim_head):
    # Pure-JAX (f32) reference mirroring the PyTorch forward.
    B, N, D = x.shape
    inner = heads * dim_head
    scale = float(dim_head) ** -0.5
    qkv = jnp.einsum("bnd,de->bne", x, wqkv)
    q, k, v = jnp.split(qkv, 3, axis=-1)

    def to_heads(t):
        return t.reshape(B, N, heads, dim_head).transpose(0, 2, 1, 3)

    q, k, v = map(to_heads, (q, k, v))
    dots = jnp.einsum("bhnd,bhmd->bhnm", q, k) * scale
    attn = jax.nn.softmax(dots, axis=-1)
    out = jnp.einsum("bhnm,bhmd->bhnd", attn, v)
    out = out.transpose(0, 2, 1, 3).reshape(B, N, inner)
    return jnp.einsum("bni,id->bnd", out, wo) + bo[0]


if __name__ == "__main__":
    # Small shapes consistent with the module: dim=32, heads=4, dim_head=16.
    B, N, D = 2, 8, 32
    heads, dim_head = 4, 16
    inner = heads * dim_head

    key = jax.random.PRNGKey(0)
    kx, kq, ko, kb = jax.random.split(key, 4)

    x = jax.random.normal(kx, (B, N, D), dtype=jnp.float32)
    wqkv = jax.random.normal(kq, (D, 3 * inner), dtype=jnp.float32) * (D ** -0.5)
    wo = jax.random.normal(ko, (inner, D), dtype=jnp.float32) * (inner ** -0.5)
    bo = jax.random.normal(kb, (1, D), dtype=jnp.float32) * 0.01

    # TODO(synk): nn.Dropout(p=0.0) / eval mode is the identity — not modeled.
    y = attention_forward(x, wqkv, wo, bo, heads=heads, dim_head=dim_head)
    y = jax.block_until_ready(y)

    y_ref = attention_reference(x, wqkv, wo, bo, heads=heads, dim_head=dim_head)
    max_err = float(jnp.max(jnp.abs(y - y_ref)))
    # bf16 inputs + bf16 MXU operands (f32 accumulation) -> loosened tolerance.
    assert jnp.allclose(y, y_ref, atol=5e-2, rtol=5e-2), (
        f"mismatch vs reference (max abs err {max_err})")

    print("KERNEL_OK")
</pallas_src>

<mosaic_0001>
module attributes {stable_mosaic.version = 11 : i64} {
  func.func @_attention_kernel(%arg0: i32, %arg1: i32, %arg2: memref<1x8x32xbf16, #tpu.memory_space<vmem>>, %arg3: memref<32x64xbf16, #tpu.memory_space<vmem>>, %arg4: memref<32x64xbf16, #tpu.memory_space<vmem>>, %arg5: memref<32x64xbf16, #tpu.memory_space<vmem>>, %arg6: memref<64x32xbf16, #tpu.memory_space<vmem>>, %arg7: memref<1x32xf32, #tpu.memory_space<vmem>>, %arg8: memref<1x8x32xf32, #tpu.memory_space<vmem>>) attributes {dimension_semantics = [#tpu.dimension_semantics<parallel>, #tpu.dimension_semantics<parallel>], iteration_bounds = array<i64: 2, 1>, scalar_prefetch = 0 : i64, scratch_operands = 0 : i64, tpu.core_type = #tpu.core_type<tc>, window_params = [{transform_indices = @transform_0, window_bounds = array<i64: 1, 8, 32>}, {pipeline_mode = #tpu.pipeline_mode<synchronous>, transform_indices = @transform_1, window_bounds = array<i64: 32, 64>}, {pipeline_mode = #tpu.pipeline_mode<synchronous>, transform_indices = @transform_2, window_bounds = array<i64: 32, 64>}, {pipeline_mode = #tpu.pipeline_mode<synchronous>, transform_indices = @transform_3, window_bounds = array<i64: 32, 64>}, {pipeline_mode = #tpu.pipeline_mode<synchronous>, transform_indices = @transform_4, window_bounds = array<i64: 64, 32>}, {pipeline_mode = #tpu.pipeline_mode<synchronous>, transform_indices = @transform_5, window_bounds = array<i64: 1, 32>}, {transform_indices = @transform_6, window_bounds = array<i64: 1, 8, 32>}]} {
    %c0 = arith.constant 0 : index
    %c0_0 = arith.constant 0 : index
    %c0_1 = arith.constant 0 : index
    %0 = vector.load %arg2[%c0, %c0_0, %c0_1] : memref<1x8x32xbf16, #tpu.memory_space<vmem>>, vector<1x8x32xbf16>
    %1 = vector.shape_cast %0 : vector<1x8x32xbf16> to vector<8x32xbf16>
    %c0_2 = arith.constant 0 : index
    %c0_3 = arith.constant 0 : index
    %2 = vector.load %arg3[%c0_2, %c0_3] : memref<32x64xbf16, #tpu.memory_space<vmem>>, vector<32x64xbf16>
    %cst = arith.constant dense<0.000000e+00> : vector<8x64xf32>
    %3 = tpu.matmul %1, %2, %cst {dimension_numbers = #tpu.dot_dimension_numbers<[1], [0], [0], [1], [0, 0, 1, 1], [], []>} : vector<8x32xbf16>, vector<32x64xbf16>, vector<8x64xf32> -> vector<8x64xf32>
    %c0_4 = arith.constant 0 : index
    %c0_5 = arith.constant 0 : index
    %4 = vector.load %arg4[%c0_4, %c0_5] : memref<32x64xbf16, #tpu.memory_space<vmem>>, vector<32x64xbf16>
    %cst_6 = arith.constant dense<0.000000e+00> : vector<8x64xf32>
    %5 = tpu.matmul %1, %4, %cst_6 {dimension_numbers = #tpu.dot_dimension_numbers<[1], [0], [0], [1], [0, 0, 1, 1], [], []>} : vector<8x32xbf16>, vector<32x64xbf16>, vector<8x64xf32> -> vector<8x64xf32>
    %c0_7 = arith.constant 0 : index
    %c0_8 = arith.constant 0 : index
    %6 = vector.load %arg5[%c0_7, %c0_8] : memref<32x64xbf16, #tpu.memory_space<vmem>>, vector<32x64xbf16>
    %cst_9 = arith.constant dense<0.000000e+00> : vector<8x64xf32>
    %7 = tpu.matmul %1, %6, %cst_9 {dimension_numbers = #tpu.dot_dimension_numbers<[1], [0], [0], [1], [0, 0, 1, 1], [], []>} : vector<8x32xbf16>, vector<32x64xbf16>, vector<8x64xf32> -> vector<8x64xf32>
    %cst_10 = arith.constant 2.500000e-01 : f32
    %8 = vector.broadcast %cst_10 : f32 to vector<8x64xf32>
    %9 = arith.mulf %3, %8 : vector<8x64xf32>
    %10 = arith.truncf %9 : vector<8x64xf32> to vector<8x64xbf16>
    %11 = arith.truncf %5 : vector<8x64xf32> to vector<8x64xbf16>
    %12 = arith.truncf %7 : vector<8x64xf32> to vector<8x64xbf16>
    %13 = vector.extract_strided_slice %10 {offsets = [0, 0], sizes = [8, 16], strides = [1, 1]} : vector<8x64xbf16> to vector<8x16xbf16>
    %14 = vector.extract_strided_slice %11 {offsets = [0, 0], sizes = [8, 16], strides = [1, 1]} : vector<8x64xbf16> to vector<8x16xbf16>
    %15 = vector.extract_strided_slice %12 {offsets = [0, 0], sizes = [8, 16], strides = [1, 1]} : vector<8x64xbf16> to vector<8x16xbf16>
    %cst_11 = arith.constant dense<0.000000e+00> : vector<8x8xf32>
    %16 = tpu.matmul %13, %14, %cst_11 {dimension_numbers = #tpu.dot_dimension_numbers<[1], [1], [0], [0], [0, 0, 1, 0], [], []>} : vector<8x16xbf16>, vector<8x16xbf16>, vector<8x8xf32> -> vector<8x8xf32>
    %cst_12 = arith.constant dense<0xFF800000> : vector<8xf32>
    %17 = vector.multi_reduction <maximumf>, %16, %cst_12 [1] : vector<8x8xf32> to vector<8xf32>
    %18 = vector.shape_cast %17 : vector<8xf32> to vector<8x1xf32>
    %19 = vector.broadcast %18 : vector<8x1xf32> to vector<8x8xf32>
    %20 = arith.subf %16, %19 : vector<8x8xf32>
    %21 = math.exp %20 : vector<8x8xf32>
    %cst_13 = arith.constant dense<0.000000e+00> : vector<8xf32>
    %22 = vector.multi_reduction <add>, %21, %cst_13 [1] : vector<8x8xf32> to vector<8xf32>
    %23 = vector.shape_cast %22 : vector<8xf32> to vector<8x1xf32>
    %24 = arith.truncf %21 : vector<8x8xf32> to vector<8x8xbf16>
    %cst_14 = arith.constant dense<0.000000e+00> : vector<8x16xf32>
    %25 = tpu.matmul %24, %15, %cst_14 {dimension_numbers = #tpu.dot_dimension_numbers<[1], [0], [0], [1], [0, 0, 1, 1], [], []>} : vector<8x8xbf16>, vector<8x16xbf16>, vector<8x16xf32> -> vector<8x16xf32>
    %26 = tpu.reciprocal %23 {approx = true} : vector<8x1xf32> -> vector<8x1xf32>
    %27 = vector.broadcast %26 : vector<8x1xf32> to vector<8x16xf32>
    %28 = arith.mulf %25, %27 : vector<8x16xf32>
    %29 = arith.truncf %28 : vector<8x16xf32> to vector<8x16xbf16>
    %30 = vector.extract_strided_slice %10 {offsets = [0, 16], sizes = [8, 16], strides = [1, 1]} : vector<8x64xbf16> to vector<8x16xbf16>
    %31 = vector.extract_strided_slice %11 {offsets = [0, 16], sizes = [8, 16], strides = [1, 1]} : vector<8x64xbf16> to vector<8x16xbf16>
    %32 = vector.extract_strided_slice %12 {offsets = [0, 16], sizes = [8, 16], strides = [1, 1]} : vector<8x64xbf16> to vector<8x16xbf16>
    %cst_15 = arith.constant dense<0.000000e+00> : vector<8x8xf32>
    %33 = tpu.matmul %30, %31, %cst_15 {dimension_numbers = #tpu.dot_dimension_numbers<[1], [1], [0], [0], [0, 0, 1, 0], [], []>} : vector<8x16xbf16>, vector<8x16xbf16>, vector<8x8xf32> -> vector<8x8xf32>
    %cst_16 = arith.constant dense<0xFF800000> : vector<8xf32>
    %34 = vector.multi_reduction <maximumf>, %33, %cst_16 [1] : vector<8x8xf32> to vector<8xf32>
    %35 = vector.shape_cast %34 : vector<8xf32> to vector<8x1xf32>
    %36 = vector.broadcast %35 : vector<8x1xf32> to vector<8x8xf32>
    %37 = arith.subf %33, %36 : vector<8x8xf32>
    %38 = math.exp %37 : vector<8x8xf32>
    %cst_17 = arith.constant dense<0.000000e+00> : vector<8xf32>
    %39 = vector.multi_reduction <add>, %38, %cst_17 [1] : vector<8x8xf32> to vector<8xf32>
    %40 = vector.shape_cast %39 : vector<8xf32> to vector<8x1xf32>
    %41 = arith.truncf %38 : vector<8x8xf32> to vector<8x8xbf16>
    %cst_18 = arith.constant dense<0.000000e+00> : vector<8x16xf32>
    %42 = tpu.matmul %41, %32, %cst_18 {dimension_numbers = #tpu.dot_dimension_numbers<[1], [0], [0], [1], [0, 0, 1, 1], [], []>} : vector<8x8xbf16>, vector<8x16xbf16>, vector<8x16xf32> -> vector<8x16xf32>
    %43 = tpu.reciprocal %40 {approx = true} : vector<8x1xf32> -> vector<8x1xf32>
    %44 = vector.broadcast %43 : vector<8x1xf32> to vector<8x16xf32>
    %45 = arith.mulf %42, %44 : vector<8x16xf32>
    %46 = arith.truncf %45 : vector<8x16xf32> to vector<8x16xbf16>
    %47 = vector.extract_strided_slice %10 {offsets = [0, 32], sizes = [8, 16], strides = [1, 1]} : vector<8x64xbf16> to vector<8x16xbf16>
    %48 = vector.extract_strided_slice %11 {offsets = [0, 32], sizes = [8, 16], strides = [1, 1]} : vector<8x64xbf16> to vector<8x16xbf16>
    %49 = vector.extract_strided_slice %12 {offsets = [0, 32], sizes = [8, 16], strides = [1, 1]} : vector<8x64xbf16> to vector<8x16xbf16>
    %cst_19 = arith.constant dense<0.000000e+00> : vector<8x8xf32>
    %50 = tpu.matmul %47, %48, %cst_19 {dimension_numbers = #tpu.dot_dimension_numbers<[1], [1], [0], [0], [0, 0, 1, 0], [], []>} : vector<8x16xbf16>, vector<8x16xbf16>, vector<8x8xf32> -> vector<8x8xf32>
    %cst_20 = arith.constant dense<0xFF800000> : vector<8xf32>
    %51 = vector.multi_reduction <maximumf>, %50, %cst_20 [1] : vector<8x8xf32> to vector<8xf32>
    %52 = vector.shape_cast %51 : vector<8xf32> to vector<8x1xf32>
    %53 = vector.broadcast %52 : vector<8x1xf32> to vector<8x8xf32>
    %54 = arith.subf %50, %53 : vector<8x8xf32>
    %55 = math.exp %54 : vector<8x8xf32>
    %cst_21 = arith.constant dense<0.000000e+00> : vector<8xf32>
    %56 = vector.multi_reduction <add>, %55, %cst_21 [1] : vector<8x8xf32> to vector<8xf32>
    %57 = vector.shape_cast %56 : vector<8xf32> to vector<8x1xf32>
    %58 = arith.truncf %55 : vector<8x8xf32> to vector<8x8xbf16>
    %cst_22 = arith.constant dense<0.000000e+00> : vector<8x16xf32>
    %59 = tpu.matmul %58, %49, %cst_22 {dimension_numbers = #tpu.dot_dimension_numbers<[1], [0], [0], [1], [0, 0, 1, 1], [], []>} : vector<8x8xbf16>, vector<8x16xbf16>, vector<8x16xf32> -> vector<8x16xf32>
    %60 = tpu.reciprocal %57 {approx = true} : vector<8x1xf32> -> vector<8x1xf32>
    %61 = vector.broadcast %60 : vector<8x1xf32> to vector<8x16xf32>
    %62 = arith.mulf %59, %61 : vector<8x16xf32>
    %63 = arith.truncf %62 : vector<8x16xf32> to vector<8x16xbf16>
    %64 = vector.extract_strided_slice %10 {offsets = [0, 48], sizes = [8, 16], strides = [1, 1]} : vector<8x64xbf16> to vector<8x16xbf16>
    %65 = vector.extract_strided_slice %11 {offsets = [0, 48], sizes = [8, 16], strides = [1, 1]} : vector<8x64xbf16> to vector<8x16xbf16>
    %66 = vector.extract_strided_slice %12 {offsets = [0, 48], sizes = [8, 16], strides = [1, 1]} : vector<8x64xbf16> to vector<8x16xbf16>
    %cst_23 = arith.constant dense<0.000000e+00> : vector<8x8xf32>
    %67 = tpu.matmul %64, %65, %cst_23 {dimension_numbers = #tpu.dot_dimension_numbers<[1], [1], [0], [0], [0, 0, 1, 0], [], []>} : vector<8x16xbf16>, vector<8x16xbf16>, vector<8x8xf32> -> vector<8x8xf32>
    %cst_24 = arith.constant dense<0xFF800000> : vector<8xf32>
    %68 = vector.multi_reduction <maximumf>, %67, %cst_24 [1] : vector<8x8xf32> to vector<8xf32>
    %69 = vector.shape_cast %68 : vector<8xf32> to vector<8x1xf32>
    %70 = vector.broadcast %69 : vector<8x1xf32> to vector<8x8xf32>
    %71 = arith.subf %67, %70 : vector<8x8xf32>
    %72 = math.exp %71 : vector<8x8xf32>
    %cst_25 = arith.constant dense<0.000000e+00> : vector<8xf32>
    %73 = vector.multi_reduction <add>, %72, %cst_25 [1] : vector<8x8xf32> to vector<8xf32>
    %74 = vector.shape_cast %73 : vector<8xf32> to vector<8x1xf32>
    %75 = arith.truncf %72 : vector<8x8xf32> to vector<8x8xbf16>
    %cst_26 = arith.constant dense<0.000000e+00> : vector<8x16xf32>
    %76 = tpu.matmul %75, %66, %cst_26 {dimension_numbers = #tpu.dot_dimension_numbers<[1], [0], [0], [1], [0, 0, 1, 1], [], []>} : vector<8x8xbf16>, vector<8x16xbf16>, vector<8x16xf32> -> vector<8x16xf32>
    %77 = tpu.reciprocal %74 {approx = true} : vector<8x1xf32> -> vector<8x1xf32>
    %78 = vector.broadcast %77 : vector<8x1xf32> to vector<8x16xf32>
    %79 = arith.mulf %76, %78 : vector<8x16xf32>
    %80 = arith.truncf %79 : vector<8x16xf32> to vector<8x16xbf16>
    %81 = tpu.concatenate %29, %46, %63, %80 in 1 : vector<8x16xbf16>, vector<8x16xbf16>, vector<8x16xbf16>, vector<8x16xbf16> -> vector<8x64xbf16>
    %c0_27 = arith.constant 0 : index
    %c0_28 = arith.constant 0 : index
    %82 = vector.load %arg6[%c0_27, %c0_28] : memref<64x32xbf16, #tpu.memory_space<vmem>>, vector<64x32xbf16>
    %cst_29 = arith.constant dense<0.000000e+00> : vector<8x32xf32>
    %83 = tpu.matmul %81, %82, %cst_29 {dimension_numbers = #tpu.dot_dimension_numbers<[1], [0], [0], [1], [0, 0, 1, 1], [], []>} : vector<8x64xbf16>, vector<64x32xbf16>, vector<8x32xf32> -> vector<8x32xf32>
    %c0_30 = arith.constant 0 : index
    %c0_31 = arith.constant 0 : index
    %84 = vector.load %arg7[%c0_30, %c0_31] : memref<1x32xf32, #tpu.memory_space<vmem>>, vector<1x32xf32>
    %85 = vector.broadcast %84 : vector<1x32xf32> to vector<8x32xf32>
    %86 = arith.addf %83, %85 : vector<8x32xf32>
    %c0_32 = arith.constant 0 : index
    %c0_33 = arith.constant 0 : index
    %c0_34 = arith.constant 0 : index
    %87 = vector.load %arg8[%c0_32, %c0_33, %c0_34] : memref<1x8x32xf32, #tpu.memory_space<vmem>>, vector<1x8x32xf32>
    %88 = vector.shape_cast %87 : vector<1x8x32xf32> to vector<8x32xf32>
    %89 = vector.shape_cast %86 : vector<8x32xf32> to vector<1x8x32xf32>
    tpu.vector_store %arg8[%c0_32, %c0_33, %c0_34], %89 {strides = array<i32>} : memref<1x8x32xf32, #tpu.memory_space<vmem>>, vector<1x8x32xf32>,
    return
  }
  func.func @transform_0(%arg0: i32, %arg1: i32) -> (i32, i32, i32) {
    %c0_i32 = arith.constant 0 : i32
    %c0_i32_0 = arith.constant 0 : i32
    %c0_i32_1 = arith.constant 0 : i32
    return %arg0, %c0_i32, %c0_i32_0 : i32, i32, i32
  }
  func.func @transform_1(%arg0: i32, %arg1: i32) -> (i32, i32) {
    %c0_i32 = arith.constant 0 : i32
    %c0_i32_0 = arith.constant 0 : i32
    %c0_i32_1 = arith.constant 0 : i32
    return %c0_i32, %c0_i32_0 : i32, i32
  }
  func.func @transform_2(%arg0: i32, %arg1: i32) -> (i32, i32) {
    %c0_i32 = arith.constant 0 : i32
    %c0_i32_0 = arith.constant 0 : i32
    %c0_i32_1 = arith.constant 0 : i32
    return %c0_i32, %c0_i32_0 : i32, i32
  }
  func.func @transform_3(%arg0: i32, %arg1: i32) -> (i32, i32) {
    %c0_i32 = arith.constant 0 : i32
    %c0_i32_0 = arith.constant 0 : i32
    %c0_i32_1 = arith.constant 0 : i32
    return %c0_i32, %c0_i32_0 : i32, i32
  }
  func.func @transform_4(%arg0: i32, %arg1: i32) -> (i32, i32) {
    %c0_i32 = arith.constant 0 : i32
    %c0_i32_0 = arith.constant 0 : i32
    %c0_i32_1 = arith.constant 0 : i32
    return %c0_i32, %c0_i32_0 : i32, i32
  }
  func.func @transform_5(%arg0: i32, %arg1: i32) -> (i32, i32) {
    %c0_i32 = arith.constant 0 : i32
    %c0_i32_0 = arith.constant 0 : i32
    %c0_i32_1 = arith.constant 0 : i32
    return %c0_i32, %c0_i32_0 : i32, i32
  }
  func.func @transform_6(%arg0: i32, %arg1: i32) -> (i32, i32, i32) {
    %c0_i32 = arith.constant 0 : i32
    %c0_i32_0 = arith.constant 0 : i32
    return %arg0, %arg1, %c0_i32 : i32, i32, i32
  }
}

</mosaic_0001>

<bundles_post_ra>
// kernel: tpu_custom_call.1
= control target key start
LH: loop header
LB: loop body
LE: loop exit
PB: predicated region body
PF: predicated region fallthrough
CT: control target
= control target key end

     0   :  { %11 = vsyncpa [#allocation3], 0  ;;  %s1759_s0 = inlined_call_operand.hbm [shape: bf16[2,8,32], index: 0, kind: input, shape index: {}]   ;;  %s1760_s1 = inlined_call_operand.vmem [shape: bf16[32,64], index: 1, kind: input, shape index: {}]   ;;  %s1761_s2 = inlined_call_operand.vmem [shape: bf16[32,64], index: 2, kind: input, shape index: {}]   ;;  %s1762_s3 = inlined_call_operand.vmem [shape: bf16[32,64], index: 3, kind: input, shape index: {}]   ;;  %s1763_s4 = inlined_call_operand.vmem [shape: bf16[64,32], index: 4, kind: input, shape index: {}]   ;;  %s1764_s5 = inlined_call_operand.vmem [shape: f32[1,32], index: 5, kind: input, shape index: {}]   ;;  %s1765_s6 = inlined_call_operand.hbm [shape: f32[2,8,32], index: 6, kind: output, shape index: {}]  }
   0x1   :  { %13 = vsyncpa [#allocation3 + $0x1], 0 }
   0x2   :  { %14 = vsyncpa [#allocation4], 0 }
   0x3   :  { %16 = vsyncpa [#allocation4 + $0x1], 0  ;;  %s1498_s21 = smov 0   ;;  %s1500_s22 = smov 0  }
   0x4   :  { %s1502_s23 = smov 0   ;;  %s1504_s24 = smov 0  }
   0x5   :  { %s1506_s25 = smov 0   ;;  %s1508_s26 = smov 0  }
   0x6 LB: > { %s1097_s27 = sadd.s32 4294967295, %s1451_s26   ;;  %s1098_s28 = sadd.s32 4294967294, %s1451_s26   ;;  %s1451_s26 = sphi %s1508_s26, %s22_s26   ;;  %s1447_s25 = sphi %s1506_s25, %s1777_s25   ;;  %s1443_s24 = sphi %s1504_s24, %s1776_s24   ;;  %s1439_s23 = sphi %s1502_s23, %s1775_s23   ;;  %s1435_s22 = sphi %s1500_s22, %s1774_s22   ;;  %s1431_s21 = sphi %s1498_s21, %s1773_s21  }
   0x7   : > { %s34_s29 = sadd.s32 1, %s1447_s25  ;;  %s41_s30 = sadd.s32 1, %s1439_s23 }
   0x8   : > { %p36_p0 = scmp.ge.s32.totalorder %s34_s29, 2  ;;  %p48_p1 = scmp.ne.s32.totalorder %s1439_s23, %s1435_s22 }
   0x9   : > { %p49_p2 = scmp.eq.s32.totalorder %s1451_s26, 0  ;;  %p54_p3 = scmp.ne.s32.totalorder %s1435_s22, %s1431_s21 }
   0xa   : > { %s1779_s29 = smov (%p36_p0, %s34_s29), 0  ;;  %p55_p5 = scmp.eq.s32.totalorder %s1097_s27, 0 }
   0xb   : > { %p1539_p4 = por %p49_p2, %p48_p1  ;;  %s38_s8 = ssub.s32 %s1447_s25, %s1779_s29 }
   0xc   : > { %p185_p6 = scmp.eq.s32.totalorder %s1097_s27, 1  ;;  %p39_p7 = scmp.eq.s32.totalorder %s38_s8, 0 }
   0xd   : > { %p1545_p8 = por %p55_p5, %p54_p3  ;;  %p191_p10 = scmp.eq.s32.totalorder %s1098_s28, 1 }
   0xe   : > { %p1549_p9 = por %p185_p6, %p48_p1  ;;  %p1259_p13 = scmp.lt.s32.totalorder %s1451_s26, 2 }
   0xf   : > { %s1554_s11 = scalar_select %p39_p7, %s1439_s23, %s41_s30  }
  0x10   : > { %p1556_p11 = por %p191_p10, %p54_p3  ;;  %s226_s13 = sand.u32 1, %s1439_s23  }
  0x11   : > { %s1101_s14 = sshll.u32 %s226_s13, 2  ;;  %s1102_s15 = sshll.u32 %s1447_s25, 6 }
  0x12   : > { %s1769_s12 = scalar_select %p1556_p11, 1, 0 }
  0x13   : > { %s235_s18 = scalar_lea.hbm %s1759_s0, %s1102_s15  ;;  %s230_s19 = scalar_lea.vmem [#allocation2], %s1101_s14 }
  0x14   : > { %s237_s20 = sshll.u32 %s230_s19, 4  ;;  %p1569_p0 = pnand %p1259_p13, %p1539_p4  ;;  %s238_s20 = int_to_ptr.vmem [resolvable:$true] %s237_s20 }
  0x15   : > { %p1103_p1 = scmp.ge.s32.totalorder %s1451_s26, 1  ;;  %p242_p2 = scmp.lt.s32.totalorder %s1451_s26, 3 }
  0x16   : > { %s227_s28 = scalar_lea.sflag [#allocation3], %s226_s13  ;;  %p1345_p3 = pneg %p1569_p0 }
  0x17   : > { %s1356_s30 = scalar_lea.vmem %s238_s20, 64  ;;  %s1453_s8 = smov [#allocation2]  }
  0x18   : > { %p1357_p5 = scmp.ne.s32.totalorder %s238_s20, %s1356_s30  ;;  %s1361_s15 = sshll.u32 %s1453_s8, 4  ;;  %s1362_s15 = int_to_ptr.vmem [resolvable:$false] %s1361_s15 }
  0x19   : > { %s1363_s14 = scalar_lea.vmem %s1362_s15, 128  ;;  %p1364_p10 = scmp.lt.s32.totalorder %s238_s20, %s1362_s15 }
  0x1a   : > { %p1359_p6 = pnand %p1357_p5, %p1345_p3  ;;  %p1365_p12 = scmp.lt.s32.totalorder %s1363_s14, %s1356_s30 }
  0x1c   : > { %p1360_p7 = pneg %p1359_p6  ;;  %p1366_p4 = por %p1365_p12, %p1364_p10 }
  0x1e   : > { %p1367_p13 = pnand %p1366_p4, %p1360_p7 }
  0x20   : > { %1370 = shalt.err (!%p1367_p13)
}
  0x21   : > { %1254 = dma.hbm_to_vmem [thread:$0]  (!%p1569_p0), %s235_s18, 64, %s238_s20, %s227_s28  }
  0x22   : > { %p243_p11 = pnand %p1103_p1, %p242_p2 }
  0x23   : > { %s1584_s7 = sand.u32 (!%p243_p11), 1, %s1435_s22  }
  0x24   : > { %246 = sbr.rel (%p243_p11) target bundleno = 1260 (0x4ec), region = 44  ;;  %s1104_s13 = sshll.u32 (!%p243_p11), %s1584_s7, 2 }
  0x25   : > { %s249_s16 = scalar_lea.sflag (!%p243_p11), [#allocation3], %s1584_s7  ;;  %s252_s17 = scalar_lea.vmem (!%p243_p11), [#allocation2], %s1104_s13 }
  0x29   : > { %1422 = dma.done.wait (%p1545_p8), %s249_s16, 64  }
  0x2a   : > { %1424 = vsyncadd (%p1545_p8), %s249_s16, 4294967232  ;;  %v1454_v0 = vmov 0.0   ;;  %vm1455_vm0 = vmmov 0   ;;  %v1317_v1 = vld [vmem:[%s1760_s1 + $0x8] sm:$0xff]   ;;  %v1319_v3 = vld [vmem:[%s1760_s1] sm:$0xff]   ;;  %vm299_vm1 = vcmask 261120  }
  0x2b   : > { %1163 = vmatprep.subr.bf16.mxu0 %v1454_v0  ;;  %1171 = vmatprep.subr.bf16.mxu1 %v1454_v0  ;;  %v1318_v2 = vld [vmem:[%s1761_s2 + $0x8] sm:$0xff]   ;;  %v1320_v4 = vld [vmem:[%s1761_s2] sm:$0xff]   ;;  %vm459_vm2 = vcmask 130048   ;;  %s1456_s15 = smov 96   ;;  %s1457_s14 = smov 112   ;;  %vm506_vm3 = vcmask 64512  }
  0x2c   : > { %1167 = vmatprep.mubr.msk.bf16.mxu0 %vm1455_vm0, %v1454_v0  ;;  %1175 = vmatprep.mubr.msk.bf16.mxu1 %vm1455_vm0, %v1454_v0  ;;  %v282_v5 = vld [vmem:[%s252_s17] sm:$0xf]  ;;  %s1458_s13 = smov 80   ;;  %v1321_v18 = vld [vmem:[%s1762_s3 + $0x8] sm:$0xff]   ;;  %vm520_vm4 = vcmask 1043456   ;;  %s1460_s16 = smov 32  }
  0x2d   : > { %1164 = vmatpush3.bf16.msra.mxu0 %v1317_v1  ;;  %1172 = vmatpush3.bf16.msra.mxu1 %v1318_v2  ;;  %v1322_v19 = vld [vmem:[%s1762_s3] sm:$0xff]   ;;  %s1461_s17 = smov 48   ;;  %vm917_vm5 = vcmask 392192   ;;  %vm959_vm6 = vcmask 523264   ;;  %s1105_s18 = sshll.u32 %s1584_s7, 3 }
  0x2e   : > { %1165 = vmatprep.subr.bf16.mxu0 %v1454_v0  ;;  %1173 = vmatprep.subr.bf16.mxu1 %v1454_v0  ;;  %s1130_s27 = sshll.u32 %s1443_s24, 7  ;;  %s280_s9 = scalar_lea.vmem [#allocation5], %s1105_s18 }
  0x2f   : > { %s1018_s28 = sshll.u32 %s280_s9, 4  ;;  %s1712_s28 = int_to_ptr.vmem [resolvable:$true] %s1018_s28 }
  0x30   : > { %s1371_s24 = scalar_lea.vmem %s1712_s28, 128 }
  0x31   : > { %1166 = vmatpush3.bf16.msra.mxu0 %v1319_v3  ;;  %1174 = vmatpush3.bf16.msra.mxu1 %v1320_v4  ;;  %p1372_p8 = scmp.ne.s32.totalorder %s1712_s28, %s1371_s24 }
  0x32   : > { %1179 = vmatprep.subr.bf16.mxu0 %v1454_v0  ;;  %1187 = vmatprep.subr.bf16.mxu1 %v1454_v0 }
  0x33   : > { %p1373_p11 = pnand %p1372_p8, %p1549_p9 }
  0x34   : > { %1168 = vmatmul.mubr.msk.bf16.vlgmr.msra.gmra.mxu0 %vm299_vm1, %v282_v5  ;;  %1176 = vmatmul.mubr.msk.bf16.vlgmr.msra.gmra.mxu1 %vm299_vm1, %v282_v5 }
  0x35   : > { %1183 = vmatprep.mubr.msk.bf16.mxu0 %vm1455_vm0, %v1454_v0  ;;  %1189 = vmatprep.mubr.msk.bf16.mxu1 %vm1455_vm0, %v1454_v0  ;;  %p1374_p12 = pneg %p1373_p11 }
  0x36   : > { %1180 = vmatpush3.bf16.msra.mxu0 %v1321_v18 }
  0x37   : > { %1181 = vmatprep.subr.bf16.mxu0 %v1454_v0 }
  0x3a   : > { %1182 = vmatpush3.bf16.msra.mxu0 %v1322_v19 }
  0x3b   : > { %1193 = vmatprep.subr.bf16.mxu0 %v1454_v0 }
  0x3d   : > { %1184 = vmatmul.mubr.msk.bf16.vlgmr.msra.gmra.mxu0 %vm299_vm1, %v282_v5 }
  0x3e   : > { %1195 = vmatprep.mubr.msk.bf16.mxu0 %vm1455_vm0, %v1454_v0 }
  0xf4   : > { %v337_v6 = vpop.f32.mrf.mxu0  ;;  %v393_v8 = vpop.f32.mrf.mxu1 }
  0xf5   : > { %v455_v7 = vmul.f32 0.25, %v337_v6  ;;  %v457_v9 = vpack.c.bf16 %v393_v8, %v393_v8 }
  0xf6   : > { %v1169_v10 = vpop.f32.mrf.mxu0  ;;  %v1177_v11 = vpop.f32.mrf.mxu1 }
  0xf7   : > { %v456_v12 = vpack.c.bf16 %v455_v7, %v455_v7  ;;  %683 = vrot.lane.b32.xlu1 %v457_v9, %s1456_s15  ;;  %571 = vrot.lane.b32.xlu0 %v457_v9, %s1457_s14  ;;  %v464_v14 = vsel %vm459_vm2, %v457_v9, 0 }
  0xf8   : > { %v340_v13 = vpop.f32.mrf.mxu0  ;;  %v396_v15 = vpop.f32.mrf.mxu1  ;;  %1188 = vmatpush3.bf16.xpose.msra.mxu1 %v464_v14 }
  0xf9   : > { %1199 = vmatprep.subr.bf16.mxu1 %v1454_v0 }
  0xfa   : > { %v1170_v16 = vpop.f32.mrf.mxu0  ;;  %v1178_v17 = vpop.f32.mrf.mxu1 }
  0xfb   : > { %681 = vrot.lane.b32.xlu1 %v456_v12, %s1456_s15  ;;  %568 = vrot.lane.b32.xlu0 %v456_v12, %s1457_s14 }
  0xfd   : > { %v449_v34 = vpop.f32.mrf.mxu0 }
  0xfe   : > { %v458_v35 = vpack.c.bf16 %v449_v34, %v449_v34 }
  0xff   : > { %792 = vrot.lane.b32.xlu1 %v456_v12, %s1458_s13  ;;  %794 = vrot.lane.b32.xlu0 %v457_v9, %s1458_s13  ;;  %v1185_v36 = vpop.f32.mrf.mxu0 }
 0x100   : > { %1190 = vmatmul.mubr.msk.bf16.vlgmr.msra.gmra.mxu1 %vm459_vm2, %v456_v12  ;;  %v522_v37 = vsel %vm520_vm4, %v458_v35, 0  ;;  %v1326_v36 = vld [vmem:[%s1763_s4] sm:$0xff]  }
 0x101   : > { %1201 = vmatprep.mubr.msk.bf16.mxu1 %vm1455_vm0, %v1454_v0  ;;  %v452_v38 = vpop.f32.mrf.mxu0  ;;  %1194 = vmatpush3.bf16.msra.mxu0 %v522_v37 }
 0x102   : > { %1205 = vmatprep.subr.bf16.mxu0 %v1454_v0 }
 0x103   : > { %v1186_v39 = vpop.f32.mrf.mxu0 }
 0x169   : > { %v572_v20 = vpop.permute.xlu0 %571  ;;  %v684_v22 = vpop.permute.xlu1 %683 }
 0x16a   : > { %v577_v21 = vsel %vm459_vm2, %v572_v20, 0  ;;  %v689_v24 = vsel %vm459_vm2, %v684_v22, 0 }
 0x16b   : > { %1200 = vmatpush3.bf16.xpose.msra.mxu1 %v577_v21 }
 0x16c   : > { %1211 = vmatprep.subr.bf16.mxu1 %v1454_v0 }
 0x16d   : > { %v569_v23 = vpop.permute.xlu0 %568  ;;  %v682_v26 = vpop.permute.xlu1 %681 }
 0x171   : > { %v795_v25 = vpop.permute.xlu0 %794  ;;  %v793_v28 = vpop.permute.xlu1 %792 }
 0x172   : > { %1202 = vmatmul.mubr.msk.bf16.vlgmr.msra.gmra.mxu1 %vm459_vm2, %v569_v23  ;;  %v800_v27 = vsel %vm459_vm2, %v795_v25, 0 }
 0x173   : > { %1212 = vmatpush3.bf16.xpose.msra.mxu1 %v689_v24  ;;  %1213 = vmatprep.mubr.msk.bf16.mxu1 %vm1455_vm0, %v1454_v0 }
 0x174   : > { %1223 = vmatprep.subr.bf16.mxu1 %v1454_v0 }
 0x17a   : > { %1214 = vmatmul.mubr.msk.bf16.vlgmr.msra.gmra.mxu1 %vm459_vm2, %v682_v26 }
 0x17b   : > { %1224 = vmatpush3.bf16.xpose.msra.mxu1 %v800_v27  ;;  %1225 = vmatprep.mubr.msk.bf16.mxu1 %vm1455_vm0, %v1454_v0 }
 0x17c   : > { %1235 = vmatprep.subr.bf16.mxu1 %v1454_v0 }
 0x182   : > { %1226 = vmatmul.mubr.msk.bf16.vlgmr.msra.gmra.mxu1 %vm459_vm2, %v793_v28  ;;  %v1323_v28 = vld [vmem:[%s1763_s4 + $0x18] sm:$0xff]  }
 0x183   : > { %1243 = vmatprep.mubr.msk.bf16.mxu1 %vm1455_vm0, %v1454_v0  ;;  %1236 = vmatpush3.bf16.msra.mxu1 %v1323_v28 }
 0x184   : > { %1237 = vmatprep.subr.bf16.mxu1 %v1454_v0 }
 0x1c0   : > { %v500_v29 = vpop.f32.mrf.mxu1 }
 0x1c1   : > { %v507_v30 = vsel %vm506_vm3, %v500_v29, -inf }
 0x1c2   : > { %508 = vmax.xlane.f32.xlu0 %v507_v30  ;;  %v1191_v31 = vpop.f32.mrf.mxu1 }
 0x1c4   : > { %v503_v32 = vpop.f32.mrf.mxu1 }
 0x1c6   : > { %v1192_v33 = vpop.f32.mrf.mxu1 }
 0x1c7   : > { %v1325_v33 = vld [vmem:[%s1763_s4 + $0x8] sm:$0xff]  }
 0x232   : > { %v613_v40 = vpop.f32.mrf.mxu1 }
 0x233   : > { %v619_v41 = vsel %vm506_vm3, %v613_v40, -inf }
 0x234   : > { %620 = vmax.xlane.f32.xlu1 %v619_v41  ;;  %v1203_v42 = vpop.f32.mrf.mxu1 }
 0x236   : > { %v616_v43 = vpop.f32.mrf.mxu1 }
 0x238   : > { %v1204_v44 = vpop.f32.mrf.mxu1 }
 0x23a   : > { %v725_v45 = vpop.f32.mrf.mxu1 }
 0x23b   : > { %v731_v46 = vsel %vm506_vm3, %v725_v45, -inf }
 0x23c   : > { %732 = vmax.xlane.f32.xlu0 %v731_v46  ;;  %v1215_v47 = vpop.f32.mrf.mxu1 }
 0x23e   : > { %v728_v48 = vpop.f32.mrf.mxu1 }
 0x240   : > { %v1216_v49 = vpop.f32.mrf.mxu1 }
 0x242   : > { %v836_v50 = vpop.f32.mrf.mxu1 }
 0x243   : > { %v842_v51 = vsel %vm506_vm3, %v836_v50, -inf }
 0x244   : > { %843 = vmax.xlane.f32.xlu0 %v842_v51  ;;  %v1227_v52 = vpop.f32.mrf.mxu1 }
 0x245   : > { %630 = vrot.lane.b32.xlu1 %v458_v35, %s1457_s14  ;;  %s1004_s14 = scalar_lea.sflag [#allocation4], %s1584_s7 }
 0x246   : > { %v839_v53 = vpop.f32.mrf.mxu1 }
 0x248   : > { %v1228_v54 = vpop.f32.mrf.mxu1 }
 0x249   : > { %852 = vrot.lane.b32.xlu1 %v458_v35, %s1458_s13  ;;  %s1459_s13 = smov 16  }
 0x24b   : > { %v509_v55 = vpop.xlane.xlu0 %508 }
 0x24c   : > { %v510_v56 = vsub.f32 %v500_v29, %v509_v55  ;;  %v1324_v29 = vld [vmem:[%s1763_s4 + $0x10] sm:$0xff]  }
 0x24d   : > { %1238 = vmatpush3.bf16.msra.mxu1 %v1324_v29 }
 0x24e   : > { %v511_v57 = vmul.f32 1.442695, %v510_v56  ;;  %1239 = vmatprep.subr.bf16.mxu1 %v1454_v0 }
 0x250   : > { %1327 = vpow2.f32 %v511_v57 }
 0x251   : > { %1240 = vmatpush3.bf16.msra.mxu1 %v1325_v33 }
 0x252   : > { %1241 = vmatprep.subr.bf16.mxu1 %v1454_v0 }
 0x255   : > { %1242 = vmatpush3.bf16.msra.mxu1 %v1326_v36 }
 0x25a   : > { %741 = vrot.lane.b32.xlu0 %v458_v35, %s1456_s15  ;;  %s1710_s15 = scalar_lea.hbm %s1765_s6, %s1130_s27 }
 0x25d   : > { %v1328_v58 = vpop.eup %1327 }
 0x25e   : > { %v516_v59 = vpack.c.bf16 %v1328_v58, %v1328_v58  ;;  %v513_v13 = vsel %vm506_vm3, %v1328_v58, 0.0 }
 0x260   : > { %1196 = vmatmul.mubr.msk.bf16.vlgmr.msra.gmra.mxu0 %vm506_vm3, %v516_v59 }
 0x261   : > { %1207 = vmatprep.mubr.msk.bf16.mxu0 %vm1455_vm0, %v1454_v0 }
 0x2bd   : > { %v621_v60 = vpop.xlane.xlu1 %620 }
 0x2be   : > { %v622_v61 = vsub.f32 %v613_v40, %v621_v60 }
 0x2c0   : > { %v623_v62 = vmul.f32 1.442695, %v622_v61 }
 0x2c1   : > { %v631_v63 = vpop.permute.xlu1 %630 }
 0x2c2   : > { %1329 = vpow2.f32 %v623_v62  ;;  %v636_v1 = vsel %vm520_vm4, %v631_v63, 0  ;;  %v1123_v63 = vld [vmem:[%s1764_s5] ss:$0 sm:$0xff] }
 0x2c3   : > { %1206 = vmatpush3.bf16.msra.mxu0 %v636_v1 }
 0x2c4   : > { %1217 = vmatprep.subr.bf16.mxu0 %v1454_v0 }
 0x2c5   : > { %v733_v2 = vpop.xlane.xlu0 %732  ;;  %v853_v15 = vpop.permute.xlu1 %852 }
 0x2c6   : > { %v734_v3 = vsub.f32 %v725_v45, %v733_v2  ;;  %v858_v18 = vsel %vm520_vm4, %v853_v15, 0 }
 0x2c8   : > { %v735_v4 = vmul.f32 1.442695, %v734_v3 }
 0x2ca   : > { %1331 = vpow2.f32 %v735_v4 }
 0x2cd   : > { %v844_v5 = vpop.xlane.xlu0 %843 }
 0x2ce   : > { %v845_v6 = vsub.f32 %v836_v50, %v844_v5 }
 0x2cf   : > { %v1330_v7 = vpop.eup %1329 }
 0x2d0   : > { %v846_v8 = vmul.f32 1.442695, %v845_v6  ;;  %v625_v9 = vsel %vm506_vm3, %v1330_v7, 0.0  ;;  %v628_v10 = vpack.c.bf16 %v1330_v7, %v1330_v7 }
 0x2d1   : > { %v742_v11 = vpop.permute.xlu0 %741  ;;  %626 = vadd.xlane.f32.xlu1 %v625_v9 }
 0x2d2   : > { %1333 = vpow2.f32 %v846_v8  ;;  %v747_v12 = vsel %vm520_vm4, %v742_v11, 0  ;;  %1208 = vmatmul.mubr.msk.bf16.vlgmr.msra.gmra.mxu0 %vm506_vm3, %v628_v10 }
 0x2d3   : > { %1218 = vmatpush3.bf16.msra.mxu0 %v747_v12  ;;  %1219 = vmatprep.mubr.msk.bf16.mxu0 %vm1455_vm0, %v1454_v0 }
 0x2d4   : > { %1229 = vmatprep.subr.bf16.mxu0 %v1454_v0 }
 0x2d5   : > { %514 = vadd.xlane.f32.xlu1 %v513_v13 }
 0x2d7   : > { %v1332_v14 = vpop.eup %1331 }
 0x2d8   : > { %v737_v16 = vsel %vm506_vm3, %v1332_v14, 0.0  ;;  %v740_v17 = vpack.c.bf16 %v1332_v14, %v1332_v14 }
 0x2d9   : > { %738 = vadd.xlane.f32.xlu0 %v737_v16 }
 0x2da   : > { %1220 = vmatmul.mubr.msk.bf16.vlgmr.msra.gmra.mxu0 %vm506_vm3, %v740_v17 }
 0x2db   : > { %1230 = vmatpush3.bf16.msra.mxu0 %v858_v18  ;;  %1231 = vmatprep.mubr.msk.bf16.mxu0 %vm1455_vm0, %v1454_v0 }
 0x2df   : > { %v1334_v19 = vpop.eup %1333 }
 0x2e0   : > { %v848_v20 = vsel %vm506_vm3, %v1334_v19, 0.0  ;;  %v851_v21 = vpack.c.bf16 %v1334_v19, %v1334_v19 }
 0x2e1   : > { %849 = vadd.xlane.f32.xlu0 %v848_v20 }
 0x2e2   : > { %1232 = vmatmul.mubr.msk.bf16.vlgmr.msra.gmra.mxu0 %vm506_vm3, %v851_v21 }
 0x320   : > { %v558_v22 = vpop.f32.mrf.mxu0 }
 0x322   : > { %v1197_v23 = vpop.f32.mrf.mxu0 }
 0x324   : > { %v561_v24 = vpop.f32.mrf.mxu0 }
 0x326   : > { %v1198_v25 = vpop.f32.mrf.mxu0 }
 0x35a   : > { %v627_v26 = vpop.xlane.xlu1 %626 }
 0x35b   : > { %1335 = vrcp.f32 %v627_v26 }
 0x35e   : > { %v515_v53 = vpop.xlane.xlu1 %514 }
 0x362   : > { %v739_v27 = vpop.xlane.xlu0 %738 }
 0x363   : > { %1337 = vrcp.f32 %v739_v27 }
 0x368   : > { %v1336_v30 = vpop.eup %1335 }
 0x36a   : > { %v850_v31 = vpop.xlane.xlu0 %849 }
 0x36b   : > { %1339 = vrcp.f32 %v850_v31 }
 0x36c   : > { %1341 = vrcp.f32 %v515_v53 }
 0x370   : > { %v1338_v40 = vpop.eup %1337 }
 0x378   : > { %v1340_v47 = vpop.eup %1339 }
 0x379   : > { %v1342_v54 = vpop.eup %1341 }
 0x37a   : > { %v565_v55 = vmul.f32 %v1342_v54, %v558_v22 }
 0x37c   : > { %v566_v58 = vpack.c.bf16 %v565_v55, %v565_v55 }
 0x392   : > { %v672_v32 = vpop.f32.mrf.mxu0 }
 0x393   : > { %v679_v34 = vmul.f32 %v1336_v30, %v672_v32 }
 0x394   : > { %v1209_v35 = vpop.f32.mrf.mxu0 }
 0x395   : > { %v680_v37 = vpack.c.bf16 %v679_v34, %v679_v34 }
 0x396   : > { %v675_v38 = vpop.f32.mrf.mxu0 }
 0x397   : > { %904 = vrot.lane.b32.xlu0 %v680_v37, %s1459_s13  ;;  %s1462_s13 = smov [#allocation5]  }
 0x398   : > { %v1210_v39 = vpop.f32.mrf.mxu0 }
 0x39a   : > { %v783_v41 = vpop.f32.mrf.mxu0 }
 0x39b   : > { %v790_v42 = vmul.f32 %v1338_v40, %v783_v41 }
 0x39c   : > { %v1221_v43 = vpop.f32.mrf.mxu0 }
 0x39d   : > { %v791_v44 = vpack.c.bf16 %v790_v42, %v790_v42 }
 0x39e   : > { %v786_v45 = vpop.f32.mrf.mxu0 }
 0x39f   : > { %907 = vrot.lane.b32.xlu1 %v791_v44, %s1460_s16  ;;  %s1375_s16 = sshll.u32 %s1462_s13, 4  ;;  %s1376_s16 = int_to_ptr.vmem [resolvable:$false] %s1375_s16 }
 0x3a0   : > { %v1222_v46 = vpop.f32.mrf.mxu0  ;;  %p1378_p0 = scmp.lt.s32.totalorder %s1712_s28, %s1376_s16 }
 0x3a2   : > { %v894_v48 = vpop.f32.mrf.mxu0 }
 0x3a3   : > { %v901_v49 = vmul.f32 %v1340_v47, %v894_v48 }
 0x3a4   : > { %v1233_v50 = vpop.f32.mrf.mxu0 }
 0x3a5   : > { %v902_v51 = vpack.c.bf16 %v901_v49, %v901_v49 }
 0x3a6   : > { %v897_v0 = vpop.f32.mrf.mxu0 }
 0x3a7   : > { %910 = vrot.lane.b32.xlu1 %v902_v51, %s1461_s17  ;;  %s1377_s17 = scalar_lea.vmem %s1376_s16, 256 }
 0x3a8   : > { %v1234_v52 = vpop.f32.mrf.mxu0  ;;  %p1379_p1 = scmp.lt.s32.totalorder %s1377_s17, %s1371_s24 }
 0x3aa   : > { %p1380_p2 = por %p1379_p1, %p1378_p0 }
 0x3ac   : > { %p1381_p3 = pnand %p1380_p2, %p1374_p12 }
 0x409   : > { %v905_v56 = vpop.permute.xlu0 %904 }
 0x40a   : > { %v914_v59 = vsel %vm459_vm2, %v566_v58, %v905_v56 }
 0x411   : > { %v908_v57 = vpop.permute.xlu1 %907 }
 0x412   : > { %v916_v60 = vsel %vm299_vm1, %v914_v59, %v908_v57 }
 0x419   : > { %v911_v61 = vpop.permute.xlu1 %910 }
 0x41a   : > { %v919_v62 = vsel %vm917_vm5, %v916_v60, %v911_v61 }
 0x41b   : > { %1244 = vmatmul.mubr.msk.bf16.vlgmr.msra.gmra.mxu1 %vm959_vm6, %v919_v62 }
 0x4db   : > { %v996_v1 = vpop.f32.mrf.mxu1 }
 0x4dc   : > { %v997_v2 = vadd.f32 %v1123_v63, %v996_v1 }
 0x4dd   : > { %v1245_v3 = vpop.f32.mrf.mxu1 }
 0x4de   : > { %1002 = vst.msk [vmem:[%s280_s9] sm:$0xff] %vm299_vm1, %v997_v2 }
 0x4df   : > { %v999_v4 = vpop.f32.mrf.mxu1 }
 0x4e0   : > { %1384 = shalt.err (!%p1381_p3)
}
 0x4e1   : > { %s1385_s18 = scalar_lea.hbm %s1710_s15, 128  ;;  %s1389_s20 = scalar_lea.hbm %s1765_s6, 256 }
 0x4e2   : > { %p1386_p5 = scmp.ne.s32.totalorder %s1710_s15, %s1385_s18  ;;  %p1390_p10 = scmp.lt.s32.totalorder %s1710_s15, %s1765_s6 }
 0x4e3   : > { %p1391_p4 = scmp.lt.s32.totalorder %s1389_s20, %s1385_s18 }
 0x4e4   : > { %p1387_p6 = pnand %p1386_p5, %p1549_p9 }
 0x4e5   : > { %p1392_p13 = por %p1391_p4, %p1390_p10 }
 0x4e6   : > { %p1388_p7 = pneg %p1387_p6 }
 0x4e8   : > { %p1393_p8 = pnand %p1392_p13, %p1388_p7 }
 0x4ea   : > { %1396 = shalt.err (!%p1393_p8)
}
 0x4eb   : > { %1249 = dma.vmem_to_hbm [thread:$0]  (%p1549_p9), %s1712_s28, 128, %s1710_s15, %s1004_s14   ;;  %v1246_v5 = vpop.f32.mrf.mxu1 }
 0x4ec PF: > { %s1030_s30 = sand.u32 1, %s1431_s21   ;;  %p1771_p11 = scmp.ne.s32.totalorder %s1769_s12, 0 }
 0x4ed   : > { %p1772_p12 = scmp.ge.s32.totalorder %s1451_s26, 2  ;;  %s1031_s8 = scalar_lea.sflag [#allocation4], %s1030_s30 }
 0x4ef   : > { %p1256_p0 = pnand %p1772_p12, %p1771_p11 }
 0x4f1   : > { %p1257_p1 = pneg %p1256_p0 }
 0x4f3   : > { %1426 = dma.done.wait (%p1257_p1), %s1031_s8, 128  }
 0x4f4   : > { %1428 = vsyncadd (%p1257_p1), %s1031_s8, 4294967168  ;;  %s22_s26 = sadd.s32 1, %s1451_s26   ;;  %s1773_s21 = smov %s1435_s22 }
 0x4f5   : > { %p19_p2 = scmp.ge.s32.totalorder %s22_s26, 4   ;;  %s1774_s22 = smov %s1439_s23 }
 0x4f6   : > { %s1775_s23 = smov %s1554_s11  ;;  %s1776_s24 = smov %s1447_s25 }
 0x4f7   : > { %s1777_s25 = smov %s1779_s29  ;;  %21 = sbr.rel (!%p19_p2) target bundleno = 6 (0x6), region = 89 }
 0x4fc   :  { %1036 = vsyncpa [#allocation3], 1 }
 0x4fd   :  { %1038 = vsyncpa [#allocation3 + $0x1], 1 }
 0x4fe   :  { %1039 = vsyncpa [#allocation4], 1 }
 0x4ff   :  { %1041 = vsyncpa [#allocation4 + $0x1], 1 }

</bundles_post_ra>
